<compile_context>
chip_gen: v5e
topology: v5e:2x2
jax: 0.10.0
libtpu: 0.0.40
codegen_flags: <defaults>
</compile_context>

<pallas_src>
import jax
import jax.numpy as jnp
from jax.experimental import pallas as pl
from jax.experimental.pallas import tpu as pltpu

_LANE = 128
_SUBLANE = 8
_MAX_ROW_TILE = 512
# ~4 MiB input block -> 2x double-buffered input + narrow accumulators +
# tiny outputs stays well under the default scoped VMEM on v5e/v6e/v7x.
_BLOCK_BYTES_BUDGET = 4 * 1024 * 1024
_VMEM_LIMIT_BYTES = 32 * 1024 * 1024


def _round_up(x, m):
    return pl.cdiv(x, m) * m


def _choose_tiles(r, d, dtype, block_bytes):
    """Row tile from R first (dtype-aware sublanes), then column tile from budget."""
    itemsize = jnp.dtype(dtype).itemsize
    sub = max(_SUBLANE, 32 // itemsize)          # 8 f32, 16 bf16, 32 int8/fp8
    tr = _round_up(min(max(r, 1), _MAX_ROW_TILE), sub)
    budget_elems = max(block_bytes // itemsize, tr * _LANE)
    td = max(_LANE, ((budget_elems // tr) // _LANE) * _LANE)
    td = min(td, _round_up(max(d, 1), _LANE))
    return tr, td


def _make_rowwise_kernel(d, td, ncb, cpb, n_groups, ragged):
    """Kernel specialized (closure) on static tiling parameters."""
    v_tail = d - (ncb - 1) * td  # valid columns in the last (ragged) column block

    def kernel(x_ref, min_ref, max_ref, mn_acc, mx_acc):
        k = pl.program_id(2)

        def reduce_and_update(x):
            # One lane (XLU) reduce per tile -- free slot when HBM-bound.
            tile_mn = jnp.min(x, axis=1, keepdims=True)
            tile_mx = jnp.max(x, axis=1, keepdims=True)
            if cpb == 1:
                # Single column step for this group: no scratch round-trip.
                min_ref[0] = tile_mn
                max_ref[0] = tile_mx
            else:
                @pl.when(k == 0)
                def _init():
                    mn_acc[...] = tile_mn
                    mx_acc[...] = tile_mx

                @pl.when(jnp.logical_and(k > 0, k < cpb - 1))
                def _accum():
                    mn_acc[...] = jnp.minimum(mn_acc[...], tile_mn)
                    mx_acc[...] = jnp.maximum(mx_acc[...], tile_mx)

                @pl.when(k == cpb - 1)
                def _finalize():
                    # Fold the last tile in-register; single small output store.
                    min_ref[0] = jnp.minimum(mn_acc[...], tile_mn)
                    max_ref[0] = jnp.maximum(mx_acc[...], tile_mx)

        if not ragged:
            reduce_and_update(x_ref[...])
        elif ncb == 1:
            # Only one (ragged) column block: reduce just the valid window.
            reduce_and_update(x_ref[:, :v_tail])
        else:
            g = pl.program_id(1)
            if n_groups > 1:
                c_loaded = jnp.minimum(g * cpb + k, ncb - 1)
            else:
                c_loaded = k

            @pl.when(c_loaded < ncb - 1)
            def _full_block():
                reduce_and_update(x_ref[...])

            @pl.when(c_loaded == ncb - 1)
            def _ragged_block():
                reduce_and_update(x_ref[:, :v_tail])

    return kernel


def rowwise_minmax(x2d, block_bytes=_BLOCK_BYTES_BUDGET):
    """x2d: [R, D] -> (min [R, 1], max [R, 1]) in the input dtype."""
    r, d = x2d.shape
    dtype = x2d.dtype
    tr, td = _choose_tiles(r, d, dtype, block_bytes)

    r_blocks = pl.cdiv(r, tr)
    ncb = pl.cdiv(d, td)                       # total column blocks
    # If there is only one row block, split the column reduction into two
    # "parallel" groups so both v7x TensorCores get work (no-op on 1-TC chips).
    n_groups = 2 if (r_blocks == 1 and ncb >= 2) else 1
    cpb = pl.cdiv(ncb, n_groups)               # column blocks per group
    ragged = (d % td) != 0
    r_pad = r_blocks * tr

    if n_groups == 1:
        in_index = lambda i, g, k: (i, k)
    else:
        # Clamp to the last valid block; duplicate folds are idempotent for min/max.
        in_index = lambda i, g, k: (i, jnp.minimum(g * cpb + k, ncb - 1))
    out_index = lambda i, g, k: (g, i, 0)

    kernel = _make_rowwise_kernel(d, td, ncb, cpb, n_groups, ragged)

    out_shape = (
        jax.ShapeDtypeStruct((n_groups, r_pad, 1), dtype),
        jax.ShapeDtypeStruct((n_groups, r_pad, 1), dtype),
    )
    mn3, mx3 = pl.pallas_call(
        kernel,
        out_shape=out_shape,
        grid_spec=pltpu.PrefetchScalarGridSpec(
            num_scalar_prefetch=0,
            grid=(r_blocks, n_groups, cpb),
            in_specs=[pl.BlockSpec((tr, td), in_index)],
            out_specs=[
                pl.BlockSpec((1, tr, 1), out_index),
                pl.BlockSpec((1, tr, 1), out_index),
            ],
            scratch_shapes=[
                pltpu.VMEM((tr, 1), dtype),     # narrow per-row running min
                pltpu.VMEM((tr, 1), dtype),     # narrow per-row running max
            ],
        ),
        compiler_params=pltpu.CompilerParams(
            # rows / groups independent -> megacore-shardable; columns = reduction.
            dimension_semantics=("parallel", "parallel", "arbitrary"),
            vmem_limit_bytes=_VMEM_LIMIT_BYTES,
        ),
    )(x2d)

    # Fold the (<=2) group partials and drop garbage overhang rows (tiny arrays).
    mn = jnp.min(mn3, axis=0)
    mx = jnp.max(mx3, axis=0)
    if r_pad != r:
        mn = mn[:r]
        mx = mx[:r]
    return mn, mx


def _best_2d_view(x, block_bytes):
    """Free (dim-boundary) reshape to 2D maximizing useful bytes per block."""
    n = int(x.size)
    if x.ndim <= 1:
        return x.reshape(1, max(n, 1))
    best_rows, best_score = None, -1
    rows = 1
    for s in x.shape[:-1]:
        rows *= int(s)
        cols = n // rows
        tr, td = _choose_tiles(rows, cols, x.dtype, block_bytes)
        score = min(rows, tr) * min(cols, td)
        if score > best_score:
            best_rows, best_score = rows, score
    return x.reshape(best_rows, n // best_rows)


def global_minmax(x, block_bytes=_BLOCK_BYTES_BUDGET):
    """Global min/max: one streaming pass + tiny wrapper fold of row partials."""
    x2 = _best_2d_view(x, block_bytes)
    mn, mx = rowwise_minmax(x2, block_bytes)
    return jnp.min(mn), jnp.max(mx)


class ObserverBase:
    """JAX/Pallas port of ObserverBase.forward (no grad, pure stats)."""

    def __init__(self, q_level):
        self.q_level = q_level
        self.min_val = None
        self.max_val = None

    # TODO(synk): the PyTorch base class raises NotImplementedError here;
    # subclasses implement EMA / running-min-max policies (and usually keep
    # float32 buffers). Here we simply record the freshly computed range.
    def update_range(self, min_val, max_val):
        self.min_val = min_val
        self.max_val = max_val

    def forward(self, x):
        x = jnp.asarray(x)  # stats stay in the native dtype (torch.min semantics)
        if self.q_level == 'L':
            min_val, max_val = global_minmax(x)
        elif self.q_level == 'C':
            flat = x.reshape(x.shape[0], -1)
            mn, mx = rowwise_minmax(flat)
            min_val, max_val = mn[:, 0], mx[:, 0]
        elif self.q_level == 'FC':
            assert x.ndim == 2
            min_val, max_val = rowwise_minmax(x)
        else:
            raise ValueError(f"unknown q_level {self.q_level!r}")
        self.update_range(min_val, max_val)
        return min_val, max_val


if __name__ == "__main__":
    key = jax.random.PRNGKey(0)
    k1, k2, k3, k4 = jax.random.split(key, 4)

    # NCHW activation-like tensor and FC-style 2D tensors.
    x4 = jax.random.normal(k1, (2, 4, 16, 16), dtype=jnp.float32)
    x2 = jax.random.normal(k2, (8, 256), dtype=jnp.float32)
    # Non-128-divisible width -> ragged column handling.
    x2_wide = jax.random.normal(k3, (8, 4100), dtype=jnp.float32)
    # More rows than one row tile -> partial last row block + output slicing.
    x_tall = jax.random.normal(k4, (520, 40), dtype=jnp.float32)
    x4_bf16 = x4.astype(jnp.bfloat16)

    # q_level = 'L'
    obs_l = ObserverBase('L')
    mn_l, mx_l = obs_l.forward(x4)
    jax.block_until_ready((mn_l, mx_l))
    assert jnp.allclose(mn_l, jnp.min(x4)), "L min mismatch"
    assert jnp.allclose(mx_l, jnp.max(x4)), "L max mismatch"

    # q_level = 'C' (f32)
    obs_c = ObserverBase('C')
    mn_c, mx_c = obs_c.forward(x4)
    jax.block_until_ready((mn_c, mx_c))
    ref_flat = x4.reshape(x4.shape[0], -1)
    assert mn_c.shape == (2,) and mx_c.shape == (2,)
    assert jnp.allclose(mn_c, jnp.min(ref_flat, axis=1)), "C min mismatch"
    assert jnp.allclose(mx_c, jnp.max(ref_flat, axis=1)), "C max mismatch"

    # q_level = 'C' (native bf16, no upcast)
    obs_cb = ObserverBase('C')
    mn_cb, mx_cb = obs_cb.forward(x4_bf16)
    jax.block_until_ready((mn_cb, mx_cb))
    ref_flat_b = x4_bf16.reshape(x4_bf16.shape[0], -1)
    assert mn_cb.dtype == jnp.bfloat16 and mx_cb.dtype == jnp.bfloat16
    assert jnp.all(mn_cb == jnp.min(ref_flat_b, axis=1)), "C bf16 min mismatch"
    assert jnp.all(mx_cb == jnp.max(ref_flat_b, axis=1)), "C bf16 max mismatch"

    # q_level = 'FC'
    obs_fc = ObserverBase('FC')
    mn_fc, mx_fc = obs_fc.forward(x2)
    jax.block_until_ready((mn_fc, mx_fc))
    assert mn_fc.shape == (8, 1) and mx_fc.shape == (8, 1)
    assert jnp.allclose(mn_fc, jnp.min(x2, axis=1, keepdims=True)), "FC min mismatch"
    assert jnp.allclose(mx_fc, jnp.max(x2, axis=1, keepdims=True)), "FC max mismatch"

    # q_level = 'FC', ragged width (in-kernel valid-window reduce, no padding copy)
    obs_fcw = ObserverBase('FC')
    mn_fw, mx_fw = obs_fcw.forward(x2_wide)
    jax.block_until_ready((mn_fw, mx_fw))
    assert jnp.allclose(mn_fw, jnp.min(x2_wide, axis=1, keepdims=True)), "FC wide min mismatch"
    assert jnp.allclose(mx_fw, jnp.max(x2_wide, axis=1, keepdims=True)), "FC wide max mismatch"

    # q_level = 'FC', more rows than one row tile (partial edge row block)
    obs_ft = ObserverBase('FC')
    mn_ft, mx_ft = obs_ft.forward(x_tall)
    jax.block_until_ready((mn_ft, mx_ft))
    assert jnp.allclose(mn_ft, jnp.min(x_tall, axis=1, keepdims=True)), "FC tall min mismatch"
    assert jnp.allclose(mx_ft, jnp.max(x_tall, axis=1, keepdims=True)), "FC tall max mismatch"

    # Direct kernel test with a tiny block budget: forces multiple column
    # blocks, the 2-way column-group split, the clamped duplicate block and
    # the ragged tail in an accumulation step.
    mn_mb, mx_mb = rowwise_minmax(x2_wide, block_bytes=64 * 1024)
    jax.block_until_ready((mn_mb, mx_mb))
    assert jnp.allclose(mn_mb, jnp.min(x2_wide, axis=1, keepdims=True)), "multiblock min mismatch"
    assert jnp.allclose(mx_mb, jnp.max(x2_wide, axis=1, keepdims=True)), "multiblock max mismatch"

    print("KERNEL_OK")
</pallas_src>

<mosaic_0001>
module attributes {stable_mosaic.version = 11 : i64} {
  func.func @kernel(%arg0: i32, %arg1: i32, %arg2: i32, %arg3: memref<8x1024xf32, #tpu.memory_space<vmem>>, %arg4: memref<1x8x1xf32, #tpu.memory_space<vmem>>, %arg5: memref<1x8x1xf32, #tpu.memory_space<vmem>>, %arg6: memref<8x1xf32, #tpu.memory_space<vmem>>, %arg7: memref<8x1xf32, #tpu.memory_space<vmem>>) attributes {dimension_semantics = [#tpu.dimension_semantics<parallel>, #tpu.dimension_semantics<parallel>, #tpu.dimension_semantics<arbitrary>], iteration_bounds = array<i64: 1, 1, 1>, scalar_prefetch = 0 : i64, scratch_operands = 2 : i64, tpu.core_type = #tpu.core_type<tc>, window_params = [{transform_indices = @transform_0, window_bounds = array<i64: 8, 1024>}, {transform_indices = @transform_1, window_bounds = array<i64: 1, 8, 1>}, {transform_indices = @transform_2, window_bounds = array<i64: 1, 8, 1>}]} {
    %c0 = arith.constant 0 : index
    %c0_0 = arith.constant 0 : index
    %0 = vector.load %arg3[%c0, %c0_0] : memref<8x1024xf32, #tpu.memory_space<vmem>>, vector<8x1024xf32>
    %cst = arith.constant dense<0x7F800000> : vector<8xf32>
    %1 = vector.multi_reduction <minimumf>, %0, %cst [1] : vector<8x1024xf32> to vector<8xf32>
    %2 = vector.shape_cast %1 : vector<8xf32> to vector<8x1xf32>
    %cst_1 = arith.constant dense<0xFF800000> : vector<8xf32>
    %3 = vector.multi_reduction <maximumf>, %0, %cst_1 [1] : vector<8x1024xf32> to vector<8xf32>
    %4 = vector.shape_cast %3 : vector<8xf32> to vector<8x1xf32>
    %c0_2 = arith.constant 0 : index
    %c0_3 = arith.constant 0 : index
    %c0_4 = arith.constant 0 : index
    %5 = vector.load %arg4[%c0_2, %c0_3, %c0_4] : memref<1x8x1xf32, #tpu.memory_space<vmem>>, vector<1x8x1xf32>
    %6 = vector.shape_cast %5 : vector<1x8x1xf32> to vector<8x1xf32>
    %7 = vector.shape_cast %2 : vector<8x1xf32> to vector<1x8x1xf32>
    tpu.vector_store %arg4[%c0_2, %c0_3, %c0_4], %7 {strides = array<i32>} : memref<1x8x1xf32, #tpu.memory_space<vmem>>, vector<1x8x1xf32>,
    %c0_5 = arith.constant 0 : index
    %c0_6 = arith.constant 0 : index
    %c0_7 = arith.constant 0 : index
    %8 = vector.load %arg5[%c0_5, %c0_6, %c0_7] : memref<1x8x1xf32, #tpu.memory_space<vmem>>, vector<1x8x1xf32>
    %9 = vector.shape_cast %8 : vector<1x8x1xf32> to vector<8x1xf32>
    %10 = vector.shape_cast %4 : vector<8x1xf32> to vector<1x8x1xf32>
    tpu.vector_store %arg5[%c0_5, %c0_6, %c0_7], %10 {strides = array<i32>} : memref<1x8x1xf32, #tpu.memory_space<vmem>>, vector<1x8x1xf32>,
    return
  }
  func.func @transform_0(%arg0: i32, %arg1: i32, %arg2: i32) -> (i32, i32) {
    %c0_i32 = arith.constant 0 : i32
    return %arg0, %arg2 : i32, i32
  }
  func.func @transform_1(%arg0: i32, %arg1: i32, %arg2: i32) -> (i32, i32, i32) {
    %c0_i32 = arith.constant 0 : i32
    %c0_i32_0 = arith.constant 0 : i32
    return %arg1, %arg0, %c0_i32 : i32, i32, i32
  }
  func.func @transform_2(%arg0: i32, %arg1: i32, %arg2: i32) -> (i32, i32, i32) {
    %c0_i32 = arith.constant 0 : i32
    %c0_i32_0 = arith.constant 0 : i32
    return %arg1, %arg0, %c0_i32 : i32, i32, i32
  }
}

</mosaic_0001>

<bundles_post_ra>
// kernel: tpu_custom_call.1
= control target key start
LH: loop header
LB: loop body
LE: loop exit
PB: predicated region body
PF: predicated region fallthrough
CT: control target
= control target key end

     0   :  { %8 = vsyncpa [#allocation5], 0  ;;  %s190_s0 = inlined_call_operand.hbm [shape: f32[2,1024], index: 0, kind: input, shape index: {}]   ;;  %s191_s1 = inlined_call_operand.vmem [shape: f32[1,8,1], index: 1, kind: output, shape index: {0}]   ;;  %s192_s2 = inlined_call_operand.vmem [shape: f32[1,8,1], index: 2, kind: output, shape index: {1}]  }
   0x1   :  { %12 = vsyncadd [#allocation5], 768  ;;  %s13_s11 = sshll.u32 %s190_s0, 4  ;;  %s163_s12 = smov [#allocation4]   ;;  %s14_s11 = int_to_ptr.hbm [resolvable:$true] %s13_s11 }
   0x2   :  { %s15_s13 = sshll.u32 %s163_s12, 4  ;;  %s164_s14 = smov 256   ;;  %s16_s13 = int_to_ptr.vmem [resolvable:$true] %s15_s13 }
   0x3   :  { %s165_s15 = smov 16  }
   0x4   :  { %21 = dma.hbm_to_vmem [thread:$0]  %s14_s11, 256, %s16_s13, [#allocation5], %s164_s14, %s164_s14, %s165_s15  }
   0x5   :  { %161 = dma.done.wait [#allocation5], 1024  }
   0x6   :  { %162 = vsyncadd [#allocation5], 4294966272  ;;  %v26_v0 = vld [vmem:[#allocation4] sm:$0xff]  ;;  %v28_v1 = vld [vmem:[#allocation4 + $0x10] sm:$0xff]  ;;  %vm122_vm0 = vcmask 7168  }
   0x7   :  { %v30_v2 = vld [vmem:[#allocation4 + $0x20] sm:$0xff]  ;;  %42 = vst [vmem:[#allocation1] ss:$4 sm:$0xff] %v26_v0  ;;  %v27_v3 = vld [vmem:[#allocation4 + $0x8] sm:$0xff]  ;;  %v32_v4 = vld [vmem:[#allocation4 + $0x30] sm:$0xff] }
   0x8   :  { %44 = vst [vmem:[#allocation1 + $0x1] ss:$4 sm:$0xff] %v28_v1  ;;  %v29_v5 = vld [vmem:[#allocation4 + $0x18] sm:$0xff]  ;;  %v31_v6 = vld [vmem:[#allocation4 + $0x28] sm:$0xff] }
   0x9   :  { %46 = vst [vmem:[#allocation1 + $0x2] ss:$4 sm:$0xff] %v30_v2  ;;  %v33_v7 = vld [vmem:[#allocation4 + $0x38] sm:$0xff] }
   0xa   :  { %48 = vst [vmem:[#allocation1 + $0x3] ss:$4 sm:$0xff] %v32_v4 }
   0xb   :  { %50 = vst [vmem:[#allocation1 + $0x20] ss:$4 sm:$0xff] %v27_v3 }
   0xc   :  { %52 = vst [vmem:[#allocation1 + $0x21] ss:$4 sm:$0xff] %v29_v5 }
   0xd   :  { %54 = vst [vmem:[#allocation1 + $0x22] ss:$4 sm:$0xff] %v31_v6 }
   0xe   :  { %56 = vst [vmem:[#allocation1 + $0x23] ss:$4 sm:$0xff] %v33_v7 }
  0x11   :  { %v57_v8 = vld.sshfl [vmem:[#allocation1] sm:$0xff pattern:$0x73625140]  ;;  %v58_v9 = vld.sshfl [vmem:[#allocation1 + $0x8] sm:$0xff pattern:$0x73625140] }
  0x12   :  { %v59_v10 = vld.sshfl [vmem:[#allocation1 + $0x10] sm:$0xff pattern:$0x73625140]  ;;  %v60_v11 = vld.sshfl [vmem:[#allocation1 + $0x18] sm:$0xff pattern:$0x73625140] }
  0x13   :  { %82 = vst [vmem:[#allocation1] ss:$4 sm:$0xff] %v26_v0 }
  0x14   :  { %84 = vst [vmem:[#allocation1 + $0x1] ss:$4 sm:$0xff] %v28_v1 }
  0x15   :  { %v61_v12 = vld.sshfl [vmem:[#allocation1 + $0x20] sm:$0xff pattern:$0x73625140]  ;;  %v62_v13 = vld.sshfl [vmem:[#allocation1 + $0x28] sm:$0xff pattern:$0x73625140] }
  0x16   :  { %v63_v14 = vld.sshfl [vmem:[#allocation1 + $0x30] sm:$0xff pattern:$0x73625140]  ;;  %v64_v15 = vld.sshfl [vmem:[#allocation1 + $0x38] sm:$0xff pattern:$0x73625140]  ;;  %v73_v16 = vmin.f32 %v57_v8, %v61_v12  ;;  %v74_v17 = vmin.f32 %v58_v9, %v62_v13 }
  0x17   :  { %v75_v18 = vmin.f32 %v59_v10, %v63_v14  ;;  %v76_v19 = vmin.f32 %v60_v11, %v64_v15  ;;  %86 = vst [vmem:[#allocation1 + $0x2] ss:$4 sm:$0xff] %v30_v2 }
  0x18   :  { %v77_v20 = vmin.f32 %v73_v16, %v74_v17  ;;  %88 = vst [vmem:[#allocation1 + $0x3] ss:$4 sm:$0xff] %v32_v4 }
  0x19   :  { %v78_v21 = vmin.f32 %v75_v18, %v76_v19  ;;  %90 = vst [vmem:[#allocation1 + $0x20] ss:$4 sm:$0xff] %v27_v3 }
  0x1a   :  { %92 = vst [vmem:[#allocation1 + $0x21] ss:$4 sm:$0xff] %v29_v5 }
  0x1b   :  { %v79_v22 = vmin.f32 %v77_v20, %v78_v21  ;;  %94 = vst [vmem:[#allocation1 + $0x22] ss:$4 sm:$0xff] %v31_v6 }
  0x1c   :  { %96 = vst [vmem:[#allocation1 + $0x23] ss:$4 sm:$0xff] %v33_v7 }
  0x1d   :  { %80 = vmin.xlane.f32.xlu0 %v79_v22 }
  0x1f   :  { %v97_v23 = vld.sshfl [vmem:[#allocation1] sm:$0xff pattern:$0x73625140]  ;;  %v98_v24 = vld.sshfl [vmem:[#allocation1 + $0x8] sm:$0xff pattern:$0x73625140] }
  0x20   :  { %v99_v25 = vld.sshfl [vmem:[#allocation1 + $0x10] sm:$0xff pattern:$0x73625140]  ;;  %v100_v26 = vld.sshfl [vmem:[#allocation1 + $0x18] sm:$0xff pattern:$0x73625140] }
  0x23   :  { %v101_v27 = vld.sshfl [vmem:[#allocation1 + $0x20] sm:$0xff pattern:$0x73625140]  ;;  %v102_v28 = vld.sshfl [vmem:[#allocation1 + $0x28] sm:$0xff pattern:$0x73625140] }
  0x24   :  { %v103_v29 = vld.sshfl [vmem:[#allocation1 + $0x30] sm:$0xff pattern:$0x73625140]  ;;  %v104_v30 = vld.sshfl [vmem:[#allocation1 + $0x38] sm:$0xff pattern:$0x73625140]  ;;  %v113_v31 = vmax.f32 %v97_v23, %v101_v27  ;;  %v114_v32 = vmax.f32 %v98_v24, %v102_v28 }
  0x25   :  { %v115_v33 = vmax.f32 %v99_v25, %v103_v29  ;;  %v116_v34 = vmax.f32 %v100_v26, %v104_v30 }
  0x26   :  { %v117_v35 = vmax.f32 %v113_v31, %v114_v32 }
  0x27   :  { %v118_v36 = vmax.f32 %v115_v33, %v116_v34 }
  0x29   :  { %v119_v37 = vmax.f32 %v117_v35, %v118_v36 }
  0x2b   :  { %120 = vmax.xlane.f32.xlu0 %v119_v37 }
  0x90   :  { %v81_v38 = vpop.xlane.xlu0 %80 }
  0x91   :  { %123 = vst.msk [vmem:[%s191_s1] sm:$0xff] %vm122_vm0, %v81_v38 }
  0x9e   :  { %v121_v39 = vpop.xlane.xlu0 %120 }
  0x9f   :  { %124 = vst.msk [vmem:[%s192_s2] sm:$0xff] %vm122_vm0, %v121_v39 }
  0xa0   :  { %133 = vsyncpa [#allocation5], 1 }

</bundles_post_ra>
